<compile_context>
chip_gen: v6e
topology: v6e:2x2x1
jax: 0.10.0
libtpu: 0.0.40
codegen_flags: <defaults>
</compile_context>

<pallas_src>
import functools

import jax
import jax.numpy as jnp
from jax.experimental import pallas as pl
from jax.experimental.pallas import tpu as pltpu  # noqa: F401  (TPU backend)

Z_DIM = 32          # G_ema.z_dim
W_DIM = 32          # G_ema.w_dim (kept for parity with the module signature)
N_CLASSES = 3
N_COND = 3          # grid_c = first 3 slices of phase_real_c[0]
H, W = 16, 128      # synthetic generator output resolution (lane-dense W)
HW = H * W
C_ROWS = N_COND * H                     # 48
C_ROWS_PAD = ((C_ROWS + 31) // 32) * 32 + (32 if C_ROWS % 32 else 0)
C_ROWS_PAD = 64                         # 2 full (32,128) uint8 tiles


# ---------------------------------------------------------------------------
# Fused kernel:
#   MXU: z_bf16 @ w_bf16 (f32 accumulate)   -> generator stub pre-activation
#   EUP: tanh                               -> generator output in [-1, 1]
#   VPU: rint / clip / uint8 cast           -> quantized image  (output 0)
#   VPU: (c + 1) * 127.5, truncating uint8  -> ci conditioning  (output 1)
# TODO(synk): the real G_ema is an external StyleGAN-like generator passed in
#             at call time; only a deterministic linear+tanh stub is implemented.
# ---------------------------------------------------------------------------
def _fused_kernel(z_ref, w_ref, b_ref, c_ref, img_ref, ci_ref):
    acc = jnp.dot(z_ref[...], w_ref[...], preferred_element_type=jnp.float32)
    x = jnp.tanh(acc + b_ref[...])                       # [-1, 1]
    # img = rint((img - lo) * 255/(hi - lo)).clip(0,255).astype(uint8)
    img_ref[...] = jnp.clip(jnp.round((x + 1.0) * 127.5), 0.0, 255.0).astype(jnp.uint8)
    # ci = (c - lo) * 255/(hi - lo), truncating uint8 cast (matches numpy
    # .astype(np.uint8); tanh-bounded inputs keep the value inside [0, 255)).
    ci_ref[...] = ((c_ref[...] + 1.0) * 127.5).astype(jnp.uint8)


def fused_generate_quantize(z_pad_bf16, w_bf16, b_g, c_slab_pad):
    m_pad = z_pad_bf16.shape[0]
    # Single whole-array block, no grid: one-step kernel, lane-dense uint8
    # stores for both outputs, everything double-buffered well under VMEM.
    return pl.pallas_call(
        _fused_kernel,
        out_shape=(
            jax.ShapeDtypeStruct((m_pad, HW), jnp.uint8),
            jax.ShapeDtypeStruct((C_ROWS_PAD, W), jnp.uint8),
        ),
    )(z_pad_bf16, w_bf16, b_g, c_slab_pad)


# ---------------------------------------------------------------------------
# Forward: mirrors Ckpt.forward's tensor math (grid_c slicing, per-class z
# sampling, generation, quantization of imgs and conditioning sources), with
# the 3 cond-slices x n_classes batched into one generator call and the whole
# thing jitted around a single pallas_call.
# ---------------------------------------------------------------------------
@functools.partial(jax.jit, static_argnames=("n_classes",))
def ckpt_forward(phase_real_c0, w_g, b_g, key, *, n_classes):
    m = N_COND * n_classes
    # uint8 packs (32,128); pad M to a 32-row multiple for unmasked stores.
    m_pad = max(32, ((m + 31) // 32) * 32)

    # one z per (cond-slice, class) pair, sampled in a single batched call
    # (mirrors torch.randn([1, z_dim]) inside the a/clz loops).
    z = jax.random.normal(key, (m, Z_DIM), jnp.float32)
    z_pad = jnp.pad(z, ((0, m_pad - m), (0, 0))).astype(jnp.bfloat16)
    w_bf16 = w_g.astype(jnp.bfloat16)

    # conditioning source images for the 3 slices, as one lane-dense slab
    # padded to a full uint8 tile-row multiple (48 -> 64 rows).
    c_slab = phase_real_c0[:N_COND, 0].reshape(C_ROWS, W)
    c_slab_pad = jnp.pad(c_slab, ((0, C_ROWS_PAD - C_ROWS), (0, 0)))

    imgs_u8, ci_u8 = fused_generate_quantize(z_pad, w_bf16, b_g, c_slab_pad)
    imgs_u8 = imgs_u8[:m].reshape(N_COND, n_classes, H, W)
    c_u8 = ci_u8[:C_ROWS].reshape(N_COND, H, W)

    # TODO(synk): PIL.Image.save / os.makedirs / plt.clf / linviz_n_class are
    #             host-side I/O and plotting with no Pallas equivalent.
    return imgs_u8, c_u8


if __name__ == "__main__":
    root = jax.random.PRNGKey(0)
    k_c, k_w, k_b, k_z = jax.random.split(root, 4)

    # phase_real_c[0]: conditioning batch, NCHW, values in [-1, 1]
    phase_real_c0 = jnp.tanh(jax.random.normal(k_c, (4, 1, H, W), jnp.float32))

    # deterministic stub-generator parameters
    w_g = 0.1 * jax.random.normal(k_w, (Z_DIM, HW), jnp.float32)
    b_g = 0.01 * jax.random.normal(k_b, (1, HW), jnp.float32)

    imgs_u8, c_u8 = ckpt_forward(phase_real_c0, w_g, b_g, k_z, n_classes=N_CLASSES)
    jax.block_until_ready((imgs_u8, c_u8))

    # light sanity checks
    assert imgs_u8.shape == (N_COND, N_CLASSES, H, W) and imgs_u8.dtype == jnp.uint8
    assert c_u8.shape == (N_COND, H, W) and c_u8.dtype == jnp.uint8

    # conditioning path: exact match against pure-JAX reference
    ref_c = ((phase_real_c0[:N_COND, 0] + 1.0) * 127.5).astype(jnp.uint8)
    assert bool(jnp.all(c_u8 == ref_c))

    # generator path: compare against a pure-JAX reference using the same
    # bf16-input / f32-accumulate matmul, within 1 LSB.
    m = N_COND * N_CLASSES
    z_ref = jax.random.normal(k_z, (m, Z_DIM), jnp.float32)
    x_ref = jnp.tanh(
        jnp.dot(z_ref.astype(jnp.bfloat16), w_g.astype(jnp.bfloat16),
                preferred_element_type=jnp.float32) + b_g)
    ref_img = jnp.clip(jnp.round((x_ref + 1.0) * 127.5), 0.0, 255.0).astype(jnp.uint8)
    diff = jnp.abs(imgs_u8.reshape(m, HW).astype(jnp.int32) - ref_img.astype(jnp.int32))
    assert int(diff.max()) <= 1

    print("KERNEL_OK")
</pallas_src>

<mosaic_0001>
module attributes {stable_mosaic.version = 11 : i64} {
  func.func @_fused_kernel(%arg0: memref<32x32xbf16, #tpu.memory_space<vmem>>, %arg1: memref<32x2048xbf16, #tpu.memory_space<vmem>>, %arg2: memref<1x2048xf32, #tpu.memory_space<vmem>>, %arg3: memref<64x128xf32, #tpu.memory_space<vmem>>, %arg4: memref<32x2048xi8, #tpu.memory_space<vmem>>, %arg5: memref<64x128xi8, #tpu.memory_space<vmem>>) attributes {dimension_semantics = [], scalar_prefetch = 0 : i64, scratch_operands = 0 : i64, tpu.core_type = #tpu.core_type<tc>} {
    %c0 = arith.constant 0 : index
    %c0_0 = arith.constant 0 : index
    %0 = vector.load %arg0[%c0, %c0_0] : memref<32x32xbf16, #tpu.memory_space<vmem>>, vector<32x32xbf16>
    %c0_1 = arith.constant 0 : index
    %c0_2 = arith.constant 0 : index
    %1 = vector.load %arg1[%c0_1, %c0_2] : memref<32x2048xbf16, #tpu.memory_space<vmem>>, vector<32x2048xbf16>
    %cst = arith.constant dense<0.000000e+00> : vector<32x2048xf32>
    %2 = tpu.matmul %0, %1, %cst {dimension_numbers = #tpu.dot_dimension_numbers<[1], [0], [0], [1], [0, 0, 1, 1], [], []>} : vector<32x32xbf16>, vector<32x2048xbf16>, vector<32x2048xf32> -> vector<32x2048xf32>
    %c0_3 = arith.constant 0 : index
    %c0_4 = arith.constant 0 : index
    %3 = vector.load %arg2[%c0_3, %c0_4] : memref<1x2048xf32, #tpu.memory_space<vmem>>, vector<1x2048xf32>
    %4 = vector.broadcast %3 : vector<1x2048xf32> to vector<32x2048xf32>
    %5 = arith.addf %2, %4 : vector<32x2048xf32>
    %6 = math.tanh %5 : vector<32x2048xf32>
    %cst_5 = arith.constant 1.000000e+00 : f32
    %7 = vector.broadcast %cst_5 : f32 to vector<32x2048xf32>
    %8 = arith.addf %6, %7 : vector<32x2048xf32>
    %cst_6 = arith.constant 1.275000e+02 : f32
    %9 = vector.broadcast %cst_6 : f32 to vector<32x2048xf32>
    %10 = arith.mulf %8, %9 : vector<32x2048xf32>
    %11 = math.roundeven %10 : vector<32x2048xf32>
    %cst_7 = arith.constant 0.000000e+00 : f32
    %cst_8 = arith.constant 2.550000e+02 : f32
    %12 = vector.broadcast %cst_7 : f32 to vector<32x2048xf32>
    %13 = arith.maximumf %12, %11 : vector<32x2048xf32>
    %14 = vector.broadcast %cst_8 : f32 to vector<32x2048xf32>
    %15 = arith.minimumf %14, %13 : vector<32x2048xf32>
    %16 = arith.fptoui %15 : vector<32x2048xf32> to vector<32x2048xi8>
    %c0_9 = arith.constant 0 : index
    %c0_10 = arith.constant 0 : index
    %17 = vector.load %arg4[%c0_9, %c0_10] : memref<32x2048xi8, #tpu.memory_space<vmem>>, vector<32x2048xi8>
    tpu.vector_store %arg4[%c0_9, %c0_10], %16 {strides = array<i32>} : memref<32x2048xi8, #tpu.memory_space<vmem>>, vector<32x2048xi8>,
    %c0_11 = arith.constant 0 : index
    %c0_12 = arith.constant 0 : index
    %18 = vector.load %arg3[%c0_11, %c0_12] : memref<64x128xf32, #tpu.memory_space<vmem>>, vector<64x128xf32>
    %cst_13 = arith.constant 1.000000e+00 : f32
    %19 = vector.broadcast %cst_13 : f32 to vector<64x128xf32>
    %20 = arith.addf %18, %19 : vector<64x128xf32>
    %cst_14 = arith.constant 1.275000e+02 : f32
    %21 = vector.broadcast %cst_14 : f32 to vector<64x128xf32>
    %22 = arith.mulf %20, %21 : vector<64x128xf32>
    %23 = arith.fptoui %22 : vector<64x128xf32> to vector<64x128xi8>
    %c0_15 = arith.constant 0 : index
    %c0_16 = arith.constant 0 : index
    %24 = vector.load %arg5[%c0_15, %c0_16] : memref<64x128xi8, #tpu.memory_space<vmem>>, vector<64x128xi8>
    tpu.vector_store %arg5[%c0_15, %c0_16], %23 {strides = array<i32>} : memref<64x128xi8, #tpu.memory_space<vmem>>, vector<64x128xi8>,
    return
  }
}

</mosaic_0001>

<bundles_post_ra>
// kernel: ckpt_forward.1
= control target key start
LH: loop header
LB: loop body
LE: loop exit
PB: predicated region body
PF: predicated region fallthrough
CT: control target
= control target key end

     0   :  { %v2042_v3 = vmov 0   ;;  %vm310_vm0 = vcmask 261120   ;;  %s2587_s1 = inlined_call_operand.vmem [shape: bf16[32,2048], index: 1, kind: input, shape index: {}]   ;;  %s2588_s0 = inlined_call_operand.vmem [shape: bf16[32,32], index: 0, kind: input, shape index: {}]   ;;  %s2589_s2 = inlined_call_operand.vmem [shape: f32[1,2048], index: 2, kind: input, shape index: {}]   ;;  %s2590_s3 = inlined_call_operand.vmem [shape: f32[64,128], index: 3, kind: input, shape index: {}]   ;;  %s2591_s4 = inlined_call_operand.vmem [shape: u8[32,2048], index: 4, kind: output, shape index: {0}]   ;;  %s2592_s5 = inlined_call_operand.vmem [shape: u8[64,128], index: 5, kind: output, shape index: {1}]  }
   0x1   :  { %v40_v0 = vld [vmem:[%s2587_s1 + $0x80] sm:$0xff]  ;;  %v41_v2 = vld [vmem:[%s2587_s1 + $0x88] sm:$0xff]  ;;  %349 = vmatprep.mubr.bf16.mxu0 %v2042_v3  ;;  %402 = vmatprep.mubr.bf16.mxu1 %v2042_v3  ;;  %v42_v15 = vld [vmem:[%s2587_s1 + $0x90] sm:$0xff] }
   0x2   :  { %v48_v1 = vld [vmem:[%s2587_s1 + $0xc0] sm:$0xff]  ;;  %v49_v5 = vld [vmem:[%s2587_s1 + $0xc8] sm:$0xff]  ;;  %v50_v17 = vld [vmem:[%s2587_s1 + $0xd0] sm:$0xff] }
   0x3   :  { %v1480_v4 = vcombine.high %v40_v0, %v48_v1  ;;  %v1479_v6 = vcombine.low %v40_v0, %v48_v1  ;;  %v24_v7 = vld [vmem:[%s2587_s1] sm:$0xff]  ;;  %v1482_v9 = vcombine.high %v41_v2, %v49_v5  ;;  %v1481_v10 = vcombine.low %v41_v2, %v49_v5  ;;  %v25_v12 = vld [vmem:[%s2587_s1 + $0x8] sm:$0xff]  ;;  %v43_v18 = vld [vmem:[%s2587_s1 + $0x98] sm:$0xff] }
   0x4   :  { %v32_v8 = vld [vmem:[%s2587_s1 + $0x40] sm:$0xff]  ;;  %v33_v13 = vld [vmem:[%s2587_s1 + $0x48] sm:$0xff]  ;;  %v51_v19 = vld [vmem:[%s2587_s1 + $0xd8] sm:$0xff]  ;;  %v1484_v21 = vcombine.high %v42_v15, %v50_v17  ;;  %v1483_v26 = vcombine.low %v42_v15, %v50_v17 }
   0x5   :  { %v1464_v11 = vcombine.high %v24_v7, %v32_v8  ;;  %329 = vmatprep.subr.bf16.mxu0 %v1480_v4  ;;  %v1466_v14 = vcombine.high %v25_v12, %v33_v13  ;;  %382 = vmatprep.subr.bf16.mxu1 %v1482_v9  ;;  %v1463_v16 = vcombine.low %v24_v7, %v32_v8  ;;  %v2114_v23 = vld [vmem:[%s2588_s0] sm:$0xff]   ;;  %v26_v24 = vld [vmem:[%s2587_s1 + $0x10] sm:$0xff]  ;;  %v27_v27 = vld [vmem:[%s2587_s1 + $0x18] sm:$0xff]  ;;  %v60_v4 = vlaneseq }
   0x6   :  { %330 = vmatpush1.bf16.msra.mxu0 %v1479_v6  ;;  %383 = vmatpush1.bf16.msra.mxu1 %v1481_v10  ;;  %v1465_v20 = vcombine.low %v25_v12, %v33_v13  ;;  %v1486_v22 = vcombine.high %v43_v18, %v51_v19  ;;  %v34_v25 = vld [vmem:[%s2587_s1 + $0x50] sm:$0xff]  ;;  %v35_v28 = vld [vmem:[%s2587_s1 + $0x58] sm:$0xff]  ;;  %v1485_v29 = vcombine.low %v43_v18, %v51_v19  ;;  %v44_v31 = vld [vmem:[%s2587_s1 + $0xa0] sm:$0xff] }
   0x7   :  { %331 = vmatprep.subr.bf16.mxu0 %v1464_v11  ;;  %384 = vmatprep.subr.bf16.mxu1 %v1466_v14  ;;  %v1468_v30 = vcombine.high %v26_v24, %v34_v25  ;;  %v52_v32 = vld [vmem:[%s2587_s1 + $0xe0] sm:$0xff]  ;;  %v1470_v33 = vcombine.high %v27_v27, %v35_v28  ;;  %v45_v34 = vld [vmem:[%s2587_s1 + $0xa8] sm:$0xff]  ;;  %v1467_v36 = vcombine.low %v26_v24, %v34_v25  ;;  %v46_v48 = vld [vmem:[%s2587_s1 + $0xb0] sm:$0xff]  ;;  %v61_v5 = vshrl.u32 %v60_v4, 7 }
   0x8   :  { %v53_v35 = vld [vmem:[%s2587_s1 + $0xe8] sm:$0xff]  ;;  %v1469_v37 = vcombine.low %v27_v27, %v35_v28  ;;  %v1488_v38 = vcombine.high %v44_v31, %v52_v32  ;;  %v28_v41 = vld [vmem:[%s2587_s1 + $0x20] sm:$0xff]  ;;  %v1487_v43 = vcombine.low %v44_v31, %v52_v32  ;;  %v54_v49 = vld [vmem:[%s2587_s1 + $0xf0] sm:$0xff] }
   0x9   :  { %v1490_v39 = vcombine.high %v45_v34, %v53_v35  ;;  %v2149_v40 = vld [vmem:[%s2588_s0 + $0x8] sm:$0xff]   ;;  %v36_v42 = vld [vmem:[%s2587_s1 + $0x60] sm:$0xff]  ;;  %v1489_v46 = vcombine.low %v45_v34, %v53_v35  ;;  %v47_v51 = vld [vmem:[%s2587_s1 + $0xb8] sm:$0xff]  ;;  %v1492_v55 = vcombine.high %v46_v48, %v54_v49  ;;  %v1491_v59 = vcombine.low %v46_v48, %v54_v49 }
   0xa   :  { %332 = vmatpush1.bf16.msra.mxu0 %v1463_v16  ;;  %385 = vmatpush1.bf16.msra.mxu1 %v1465_v20  ;;  %v29_v44 = vld [vmem:[%s2587_s1 + $0x28] sm:$0xff]  ;;  %v1472_v47 = vcombine.high %v28_v41, %v36_v42  ;;  %v55_v52 = vld [vmem:[%s2587_s1 + $0xf8] sm:$0xff]  ;;  %v1471_v53 = vcombine.low %v28_v41, %v36_v42  ;;  %v30_v57 = vld [vmem:[%s2587_s1 + $0x30] sm:$0xff]  ;;  %v62_v6 = vsub.s32 0, %v61_v5  ;;  %v70_v8 = vsub.s32 2, %v61_v5 }
   0xb   :  { %435 = vmatprep.subr.bf16.mxu0 %v1484_v21  ;;  %488 = vmatprep.subr.bf16.mxu1 %v1486_v22  ;;  %v37_v45 = vld [vmem:[%s2587_s1 + $0x68] sm:$0xff]  ;;  %v1494_v56 = vcombine.high %v47_v51, %v55_v52  ;;  %v38_v58 = vld [vmem:[%s2587_s1 + $0x70] sm:$0xff]  ;;  %v31_v60 = vld [vmem:[%s2587_s1 + $0x38] sm:$0xff]  ;;  %v1493_v62 = vcombine.low %v47_v51, %v55_v52  ;;  %v66_v9 = vsub.s32 1, %v61_v5  ;;  %v74_v10 = vsub.s32 3, %v61_v5 }
   0xc   :  { %v1474_v50 = vcombine.high %v29_v44, %v37_v45  ;;  %v1473_v54 = vcombine.low %v29_v44, %v37_v45  ;;  %v39_v61 = vld [vmem:[%s2587_s1 + $0x78] sm:$0xff]  ;;  %v1476_v63 = vcombine.high %v30_v57, %v38_v58  ;;  %v1475_v1 = vcombine.low %v30_v57, %v38_v58  ;;  %v56_v7 = vld [vmem:[%s2589_s2] sm:$0xff]  ;;  %v57_v14 = vld [vmem:[%s2589_s2 + $0x8] sm:$0xff] }
   0xd   :  { %1495 = vmatmul.mubr.msk.bf16.vlgmr.msra.gmra.mxu0 %vm310_vm0, %v2114_v23  ;;  %1497 = vmatmul.mubr.msk.bf16.vlgmr.msra.gmra.mxu1 %vm310_vm0, %v2114_v23  ;;  %v1478_v0 = vcombine.high %v31_v60, %v39_v61  ;;  %v1477_v2 = vcombine.low %v31_v60, %v39_v61  ;;  %v78_v11 = vsub.s32 4, %v61_v5  ;;  %v86_v12 = vsub.s32 6, %v61_v5  ;;  %v1383_v31 = vld [vmem:[%s2590_s3 + $0x10] sm:$0xff]  ;;  %v1388_v44 = vld [vmem:[%s2590_s3 + $0x38] sm:$0xff] }
   0xe   :  { %436 = vmatpush1.bf16.msra.mxu0 %v1483_v26  ;;  %489 = vmatpush1.bf16.msra.mxu1 %v1485_v29  ;;  %v82_v13 = vsub.s32 5, %v61_v5  ;;  %v2233_v15 = vrot.slane %v56_v7, %v62_v6  ;;  %v2235_v16 = vrot.slane %v56_v7, %v70_v8  ;;  %v2237_v17 = vrot.slane %v56_v7, %v66_v9  ;;  %v1381_v29 = vld [vmem:[%s2590_s3] sm:$0xff] }
   0xf   :  { %359 = vmatprep.mubr.bf16.mxu0 %v2042_v3  ;;  %412 = vmatprep.mubr.bf16.mxu1 %v2042_v3  ;;  %v2239_v18 = vrot.slane %v56_v7, %v74_v10  ;;  %v2241_v19 = vrot.slane %v56_v7, %v78_v11  ;;  %v2243_v20 = vrot.slane %v56_v7, %v86_v12  ;;  %v1396_v57 = vadd.f32 1.0, %v1388_v44 }
  0x10   :  { %437 = vmatprep.subr.bf16.mxu0 %v1468_v30  ;;  %490 = vmatprep.subr.bf16.mxu1 %v1470_v33  ;;  %v2245_v21 = vrot.slane %v56_v7, %v82_v13  ;;  %v2251_v25 = vrot.slane %v57_v14, %v70_v8  ;;  %v2253_v26 = vrot.slane %v57_v14, %v66_v9  ;;  %v1382_v30 = vld [vmem:[%s2590_s3 + $0x8] sm:$0xff] }
  0x11   :  { %v2255_v27 = vrot.slane %v57_v14, %v74_v10  ;;  %v2257_v28 = vrot.slane %v57_v14, %v78_v11  ;;  %v2269_v34 = vrot.slane %v57_v14, %v86_v12  ;;  %v2271_v35 = vrot.slane %v57_v14, %v82_v13 }
  0x12   :  { %438 = vmatpush1.bf16.msra.mxu0 %v1467_v36  ;;  %491 = vmatpush1.bf16.msra.mxu1 %v1469_v37  ;;  %v1384_v36 = vld [vmem:[%s2590_s3 + $0x18] sm:$0xff]  ;;  %v1385_v37 = vld [vmem:[%s2590_s3 + $0x20] sm:$0xff]  ;;  %v1390_v45 = vadd.f32 1.0, %v1382_v30  ;;  %v1404_v10 = vmul.f32 127.5, %v1396_v57 }
  0x13   :  { %541 = vmatprep.subr.bf16.mxu0 %v1488_v38  ;;  %594 = vmatprep.subr.bf16.mxu1 %v1490_v39  ;;  %v1386_v38 = vld [vmem:[%s2590_s3 + $0x28] sm:$0xff]  ;;  %v1389_v39 = vadd.f32 1.0, %v1381_v29  ;;  %v1392_v49 = vadd.f32 1.0, %v1384_v36 }
  0x14   :  { %v1398_v61 = vmul.f32 127.5, %v1390_v45 }
  0x15   :  { %1496 = vmatmul.mubr.msk.bf16.gmra.mxu0 %vm310_vm0, %v2149_v40  ;;  %1498 = vmatmul.mubr.msk.bf16.gmra.mxu1 %vm310_vm0, %v2149_v40  ;;  %v1397_v58 = vmul.f32 127.5, %v1389_v39 }
  0x16   :  { %455 = vmatprep.mubr.bf16.mxu0 %v2042_v3  ;;  %508 = vmatprep.mubr.bf16.mxu1 %v2042_v3 }
  0x17   :  { %v1405_v11 = vmax.f32 %v1397_v58, 0.0 }
  0x1d   :  { %1499 = vmatmul.mubr.msk.bf16.vlgmr.msra.gmra.mxu0 %vm310_vm0, %v2114_v23  ;;  %1501 = vmatmul.mubr.msk.bf16.vlgmr.msra.gmra.mxu1 %vm310_vm0, %v2114_v23 }
  0x1e   :  { %542 = vmatpush1.bf16.msra.mxu0 %v1487_v43  ;;  %595 = vmatpush1.bf16.msra.mxu1 %v1489_v46  ;;  %v1387_v43 = vld [vmem:[%s2590_s3 + $0x30] sm:$0xff]  ;;  %v1391_v46 = vadd.f32 1.0, %v1383_v31 }
  0x1f   :  { %465 = vmatprep.mubr.bf16.mxu0 %v2042_v3  ;;  %518 = vmatprep.mubr.bf16.mxu1 %v2042_v3 }
  0x20   :  { %543 = vmatprep.subr.bf16.mxu0 %v1472_v47  ;;  %596 = vmatprep.subr.bf16.mxu1 %v1474_v50  ;;  %v1393_v50 = vadd.f32 1.0, %v1385_v37 }
  0x22   :  { %544 = vmatpush1.bf16.msra.mxu0 %v1471_v53  ;;  %597 = vmatpush1.bf16.msra.mxu1 %v1473_v54  ;;  %v1394_v53 = vadd.f32 1.0, %v1386_v38  ;;  %v1395_v54 = vadd.f32 1.0, %v1387_v43 }
  0x23   :  { %647 = vmatprep.subr.bf16.mxu0 %v1492_v55  ;;  %700 = vmatprep.subr.bf16.mxu1 %v1494_v56 }
  0x25   :  { %1500 = vmatmul.mubr.msk.bf16.gmra.mxu0 %vm310_vm0, %v2149_v40  ;;  %1502 = vmatmul.mubr.msk.bf16.gmra.mxu1 %vm310_vm0, %v2149_v40 }
  0x26   :  { %561 = vmatprep.mubr.bf16.mxu0 %v2042_v3  ;;  %614 = vmatprep.mubr.bf16.mxu1 %v2042_v3 }
  0x2d   :  { %1503 = vmatmul.mubr.msk.bf16.vlgmr.msra.gmra.mxu0 %vm310_vm0, %v2114_v23  ;;  %1505 = vmatmul.mubr.msk.bf16.vlgmr.msra.gmra.mxu1 %vm310_vm0, %v2114_v23 }
  0x2e   :  { %648 = vmatpush1.bf16.msra.mxu0 %v1491_v59  ;;  %701 = vmatpush1.bf16.msra.mxu1 %v1493_v62  ;;  %v1399_v62 = vmul.f32 127.5, %v1391_v46 }
  0x2f   :  { %571 = vmatprep.mubr.bf16.mxu0 %v2042_v3  ;;  %624 = vmatprep.mubr.bf16.mxu1 %v2042_v3 }
  0x30   :  { %649 = vmatprep.subr.bf16.mxu0 %v1476_v63  ;;  %702 = vmatprep.subr.bf16.mxu1 %v1478_v0 }
  0x32   :  { %650 = vmatpush1.bf16.msra.mxu0 %v1475_v1  ;;  %703 = vmatpush1.bf16.msra.mxu1 %v1477_v2  ;;  %v1400_v1 = vmul.f32 127.5, %v1392_v49  ;;  %v1401_v2 = vmul.f32 127.5, %v1393_v50 }
  0x34   :  { %v1408_v30 = vmax.f32 %v1400_v1, 0.0  ;;  %v1409_v31 = vmax.f32 %v1401_v2, 0.0 }
  0x35   :  { %1504 = vmatmul.mubr.msk.bf16.gmra.mxu0 %vm310_vm0, %v2149_v40  ;;  %1506 = vmatmul.mubr.msk.bf16.gmra.mxu1 %vm310_vm0, %v2149_v40 }
  0x36   :  { %667 = vmatprep.mubr.bf16.mxu0 %v2042_v3  ;;  %720 = vmatprep.mubr.bf16.mxu1 %v2042_v3  ;;  %v2310_v49 = vmin.f32 %v1408_v30, 255.0  ;;  %v2312_v50 = vmin.f32 %v1409_v31, 255.0 }
  0x3d   :  { %1507 = vmatmul.mubr.msk.bf16.vlgmr.msra.gmra.mxu0 %vm310_vm0, %v2114_v23  ;;  %1509 = vmatmul.mubr.msk.bf16.vlgmr.msra.gmra.mxu1 %vm310_vm0, %v2114_v23  ;;  %v2249_v23 = vrot.slane %v57_v14, %v62_v6  ;;  %v1402_v6 = vmul.f32 127.5, %v1394_v53 }
  0x3e   :  { %677 = vmatprep.mubr.bf16.mxu0 %v2042_v3  ;;  %730 = vmatprep.mubr.bf16.mxu1 %v2042_v3  ;;  %v90_v3 = vsub.s32 7, %v61_v5 }
  0x3f   :  { %v1410_v36 = vmax.f32 %v1402_v6, 0.0 }
  0x40   :  { %v2247_v22 = vrot.slane %v56_v7, %v90_v3  ;;  %v2283_v42 = vrot.slane %v57_v14, %v90_v3  ;;  %v1403_v7 = vmul.f32 127.5, %v1395_v54  ;;  %v1406_v3 = vmax.f32 %v1398_v61, 0.0 }
  0x41   :  { %v1407_v14 = vmax.f32 %v1399_v62, 0.0  ;;  %v2315_v53 = vmin.f32 %v1410_v36, 255.0 }
  0x42   :  { %v1411_v37 = vmax.f32 %v1403_v7, 0.0  ;;  %v2305_v45 = vmin.f32 %v1406_v3, 255.0 }
  0x43   :  { %v2307_v46 = vmin.f32 %v1407_v14, 255.0  ;;  %2593 = vst [vmem:[#allocation2_spill] sm:$0xff] %v2315_v53 }
  0x45   :  { %1508 = vmatmul.mubr.msk.bf16.gmra.mxu0 %vm310_vm0, %v2149_v40  ;;  %1510 = vmatmul.mubr.msk.bf16.gmra.mxu1 %vm310_vm0, %v2149_v40 }
  0xcd   :  { %v351_v24 = vpop.f32.mrf.mxu0  ;;  %v404_v33 = vpop.f32.mrf.mxu1 }
  0xce   :  { %v352_v32 = vadd.f32 %v351_v24, %v2233_v15  ;;  %v405_v40 = vadd.f32 %v404_v33, %v2235_v16 }
  0xcf   :  { %v353_v41 = vpop.f32.mrf.mxu0  ;;  %v406_v48 = vpop.f32.mrf.mxu1 }
  0xd0   :  { %1914 = vtanh.f32 %v352_v32  ;;  %v354_v47 = vadd.f32 %v353_v41, %v2237_v17  ;;  %v407_v51 = vadd.f32 %v406_v48, %v2239_v18  ;;  %v2302_v41 = vmin.f32 %v1405_v11, 255.0 }
  0xd1   :  { %1916 = vtanh.f32 %v405_v40  ;;  %v355_v52 = vpop.f32.mrf.mxu0  ;;  %v408_v56 = vpop.f32.mrf.mxu1  ;;  %v1412_v40 = vmax.f32 %v1404_v10, 0.0 }
  0xd2   :  { %1918 = vtanh.f32 %v354_v47  ;;  %v356_v55 = vadd.f32 %v355_v52, %v2233_v15  ;;  %v409_v59 = vadd.f32 %v408_v56, %v2235_v16 }
  0xd3   :  { %1920 = vtanh.f32 %v407_v51  ;;  %v357_v60 = vpop.f32.mrf.mxu0  ;;  %v410_v0 = vpop.f32.mrf.mxu1  ;;  %v2320_v57 = vmin.f32 %v1412_v40, 255.0 }
  0xd4   :  { %1922 = vtanh.f32 %v356_v55  ;;  %v358_v63 = vadd.f32 %v357_v60, %v2237_v17  ;;  %v411_v4 = vadd.f32 %v410_v0, %v2239_v18 }
  0xd5   :  { %1924 = vtanh.f32 %v409_v59  ;;  %v361_v5 = vpop.f32.mrf.mxu0  ;;  %v414_v9 = vpop.f32.mrf.mxu1  ;;  %2595 = vst [vmem:[#allocation4_spill] sm:$0xff] %v2320_v57 }
  0xd6   :  { %1926 = vtanh.f32 %v358_v63  ;;  %v362_v8 = vadd.f32 %v361_v5, %v2233_v15  ;;  %v415_v12 = vadd.f32 %v414_v9, %v2235_v16 }
  0xd7   :  { %1928 = vtanh.f32 %v411_v4  ;;  %v363_v13 = vpop.f32.mrf.mxu0  ;;  %v416_v29 = vpop.f32.mrf.mxu1 }
  0xd8   :  { %1930 = vtanh.f32 %v362_v8  ;;  %v364_v24 = vadd.f32 %v363_v13, %v2237_v17  ;;  %v417_v32 = vadd.f32 %v416_v29, %v2239_v18 }
  0xd9   :  { %1932 = vtanh.f32 %v415_v12  ;;  %v365_v33 = vpop.f32.mrf.mxu0  ;;  %v418_v39 = vpop.f32.mrf.mxu1 }
  0xda   :  { %1934 = vtanh.f32 %v364_v24  ;;  %v366_v38 = vadd.f32 %v365_v33, %v2233_v15  ;;  %v419_v43 = vadd.f32 %v418_v39, %v2235_v16  ;;  %v2317_v16 = vmin.f32 %v1411_v37, 255.0 }
  0xdb   :  { %1936 = vtanh.f32 %v417_v32  ;;  %v367_v44 = vpop.f32.mrf.mxu0  ;;  %v420_v48 = vpop.f32.mrf.mxu1 }
  0xdc   :  { %1938 = vtanh.f32 %v366_v38  ;;  %v368_v47 = vadd.f32 %v367_v44, %v2237_v17  ;;  %v421_v51 = vadd.f32 %v420_v48, %v2239_v18  ;;  %2594 = vst [vmem:[#allocation3_spill] sm:$0xff] %v2317_v16 }
  0xdd   :  { %v1915_v15 = vpop.eup %1914  ;;  %1940 = vtanh.f32 %v419_v43  ;;  %v457_v52 = vpop.f32.mrf.mxu0 }
  0xde   :  { %v1917_v54 = vpop.eup %1916  ;;  %v805_v55 = vadd.f32 1.0, %v1915_v15  ;;  %1942 = vtanh.f32 %v368_v47  ;;  %v458_v56 = vadd.f32 %v457_v52, %v2241_v19  ;;  %v510_v17 = vpop.f32.mrf.mxu1 }
  0xdf   :  { %v1919_v58 = vpop.eup %1918  ;;  %v807_v59 = vadd.f32 1.0, %v1917_v54  ;;  %1944 = vtanh.f32 %v421_v51  ;;  %v511_v60 = vadd.f32 %v510_v17, %v2243_v20  ;;  %v459_v61 = vpop.f32.mrf.mxu0 }
  0xe0   :  { %v1921_v62 = vpop.eup %1920  ;;  %v869_v63 = vmul.f32 127.5, %v805_v55  ;;  %v806_v0 = vadd.f32 1.0, %v1919_v58  ;;  %1946 = vtanh.f32 %v458_v56  ;;  %v460_v1 = vadd.f32 %v459_v61, %v2245_v21  ;;  %v512_v2 = vpop.f32.mrf.mxu1 }
  0xe1   :  { %v1923_v4 = vpop.eup %1922  ;;  %v871_v5 = vmul.f32 127.5, %v807_v59  ;;  %v808_v6 = vadd.f32 1.0, %v1921_v62  ;;  %1948 = vtanh.f32 %v511_v60  ;;  %v513_v7 = vadd.f32 %v512_v2, %v2247_v22  ;;  %v2326_v8 = vpop.f32.mrf.mxu0 }
  0xe2   :  { %v1925_v9 = vpop.eup %1924  ;;  %v1575_v10 = vclamp-gez-f32 %v869_v63, 255.0  ;;  %v870_v11 = vmul.f32 127.5, %v806_v0  ;;  %v821_v12 = vadd.f32 1.0, %v1923_v4  ;;  %1950 = vtanh.f32 %v460_v1  ;;  %v2328_v13 = vpop.f32.mrf.mxu1 }
  0xe3   :  { %v1927_v3 = vpop.eup %1926  ;;  %v1579_v14 = vclamp-gez-f32 %v871_v5, 255.0  ;;  %v872_v24 = vmul.f32 127.5, %v808_v6  ;;  %v823_v29 = vadd.f32 1.0, %v1925_v9  ;;  %1952 = vtanh.f32 %v513_v7  ;;  %v2330_v30 = vpop.f32.mrf.mxu0 }
  0xe4   :  { %v1929_v31 = vpop.eup %1928  ;;  %v1705_v32 = vcvt.f32.s32 %v1575_v10  ;;  %v1577_v33 = vclamp-gez-f32 %v870_v11, 255.0  ;;  %v885_v36 = vmul.f32 127.5, %v821_v12  ;;  %v822_v37 = vadd.f32 1.0, %v1927_v3  ;;  %v2332_v38 = vpop.f32.mrf.mxu1 }
  0xe5   :  { %v1931_v39 = vpop.eup %1930  ;;  %v1711_v40 = vcvt.f32.s32 %v1579_v14  ;;  %v1581_v43 = vclamp-gez-f32 %v872_v24, 255.0  ;;  %v887_v44 = vmul.f32 127.5, %v823_v29  ;;  %v824_v47 = vadd.f32 1.0, %v1929_v31  ;;  %v2334_v48 = vpop.f32.mrf.mxu0 }
  0xe6   :  { %v1933_v15 = vpop.eup %1932  ;;  %v1708_v51 = vcvt.f32.s32 %v1577_v33  ;;  %v1607_v52 = vclamp-gez-f32 %v885_v36, 255.0  ;;  %v886_v54 = vmul.f32 127.5, %v822_v37  ;;  %v837_v55 = vadd.f32 1.0, %v1931_v39  ;;  %v2336_v56 = vpop.f32.mrf.mxu1 }
  0xe7   :  { %v1935_v17 = vpop.eup %1934  ;;  %v1714_v58 = vcvt.f32.s32 %v1581_v43  ;;  %v1611_v59 = vclamp-gez-f32 %v887_v44, 255.0  ;;  %v888_v60 = vmul.f32 127.5, %v824_v47  ;;  %v839_v61 = vadd.f32 1.0, %v1933_v15  ;;  %v2338_v62 = vpop.f32.mrf.mxu0 }
  0xe8   :  { %v1937_v63 = vpop.eup %1936  ;;  %v1317_v0 = vpack.c.b16 %v1708_v51, %v1705_v32  ;;  %v1753_v1 = vcvt.f32.s32 %v1607_v52  ;;  %v1609_v2 = vclamp-gez-f32 %v886_v54, 255.0  ;;  %v901_v4 = vmul.f32 127.5, %v837_v55  ;;  %v2340_v5 = vpop.f32.mrf.mxu1 }
  0xe9   :  { %v1939_v6 = vpop.eup %1938  ;;  %v1318_v7 = vpack.c.b16 %v1714_v58, %v1711_v40  ;;  %v1759_v9 = vcvt.f32.s32 %v1611_v59  ;;  %v1613_v10 = vclamp-gez-f32 %v888_v60, 255.0  ;;  %v903_v11 = vmul.f32 127.5, %v839_v61  ;;  %v2342_v12 = vpop.f32.mrf.mxu0 }
  0xea   :  { %v1941_v3 = vpop.eup %1940  ;;  %v1756_v14 = vcvt.f32.s32 %v1609_v2  ;;  %v1639_v24 = vclamp-gez-f32 %v901_v4, 255.0  ;;  %v838_v29 = vadd.f32 1.0, %v1935_v17  ;;  %v840_v31 = vadd.f32 1.0, %v1937_v63  ;;  %v2344_v33 = vpop.f32.mrf.mxu1 }
  0xeb   :  { %v1943_v32 = vpop.eup %1942  ;;  %v1319_v36 = vpack.c.b8 %v1318_v7, %v1317_v0  ;;  %v1762_v37 = vcvt.f32.s32 %v1613_v10  ;;  %v1643_v39 = vclamp-gez-f32 %v903_v11, 255.0  ;;  %v853_v43 = vadd.f32 1.0, %v1939_v6  ;;  %v2346_v44 = vpop.f32.mrf.mxu0 }
  0xec   :  { %v1945_v40 = vpop.eup %1944  ;;  %v1329_v47 = vpack.c.b16 %v1756_v14, %v1753_v1  ;;  %v1801_v15 = vcvt.f32.s32 %v1639_v24  ;;  %v902_v51 = vmul.f32 127.5, %v838_v29  ;;  %v904_v52 = vmul.f32 127.5, %v840_v31  ;;  %v2348_v54 = vpop.f32.mrf.mxu1 }
  0xed   :  { %v1947_v55 = vpop.eup %1946  ;;  %1365 = vst [vmem:[%s2591_s4] sm:$0xff] %v1319_v36  ;;  %v1330_v17 = vpack.c.b16 %v1762_v37, %v1759_v9  ;;  %v1807_v58 = vcvt.f32.s32 %v1643_v39  ;;  %v917_v59 = vmul.f32 127.5, %v853_v43  ;;  %v855_v60 = vadd.f32 1.0, %v1941_v3  ;;  %v2353_v61 = vpop.f32.mrf.mxu0 }
  0xee   :  { %v1949_v63 = vpop.eup %1948  ;;  %v1641_v0 = vclamp-gez-f32 %v902_v51, 255.0  ;;  %v1645_v2 = vclamp-gez-f32 %v904_v52, 255.0  ;;  %v854_v1 = vadd.f32 1.0, %v1943_v32  ;;  %v856_v4 = vadd.f32 1.0, %v1945_v40  ;;  %v2355_v6 = vpop.f32.mrf.mxu1 }
  0xef   :  { %v1951_v7 = vpop.eup %1950  ;;  %v1331_v10 = vpack.c.b8 %v1330_v17, %v1329_v47  ;;  %v1671_v11 = vclamp-gez-f32 %v917_v59, 255.0  ;;  %v919_v14 = vmul.f32 127.5, %v855_v60  ;;  %v809_v24 = vadd.f32 1.0, %v1947_v55  ;;  %v2357_v29 = vpop.f32.mrf.mxu0 }
  0xf0   :  { %v1953_v9 = vpop.eup %1952  ;;  %v1804_v31 = vcvt.f32.s32 %v1641_v0  ;;  %v1810_v36 = vcvt.f32.s32 %v1645_v2  ;;  %v918_v3 = vmul.f32 127.5, %v854_v1  ;;  %v920_v37 = vmul.f32 127.5, %v856_v4  ;;  %v2359_v39 = vpop.f32.mrf.mxu1 }
  0xf1   :  { %1369 = vst [vmem:[%s2591_s4 + $0x20] sm:$0xff] %v1331_v10  ;;  %v1849_v32 = vcvt.f32.s32 %v1671_v11  ;;  %v1675_v43 = vclamp-gez-f32 %v919_v14, 255.0  ;;  %v873_v40 = vmul.f32 127.5, %v809_v24  ;;  %v811_v47 = vadd.f32 1.0, %v1949_v63  ;;  %v2364_v51 = vpop.f32.mrf.mxu0 }
  0xf2   :  { %v1341_v52 = vpack.c.b16 %v1804_v31, %v1801_v15  ;;  %v1342_v55 = vpack.c.b16 %v1810_v36, %v1807_v58  ;;  %v1673_v17 = vclamp-gez-f32 %v918_v3, 255.0  ;;  %v1677_v59 = vclamp-gez-f32 %v920_v37, 255.0  ;;  %v2366_v60 = vpop.f32.mrf.mxu1 }
  0xf3   :  { %v1855_v0 = vcvt.f32.s32 %v1675_v43  ;;  %v1583_v2 = vclamp-gez-f32 %v873_v40, 255.0  ;;  %v875_v1 = vmul.f32 127.5, %v811_v47  ;;  %v810_v4 = vadd.f32 1.0, %v1951_v7  ;;  %v2368_v18 = vpop.f32.mrf.mxu0 }
  0xf4   :  { %v1343_v57 = vpack.c.b8 %v1342_v55, %v1341_v52  ;;  %v1852_v10 = vcvt.f32.s32 %v1673_v17  ;;  %v1858_v11 = vcvt.f32.s32 %v1677_v59  ;;  %v812_v14 = vadd.f32 1.0, %v1953_v9  ;;  %v622_v24 = vpop.f32.mrf.mxu1 }
  0xf5   :  { %v1717_v63 = vcvt.f32.s32 %v1583_v2  ;;  %v1587_v16 = vclamp-gez-f32 %v875_v1, 255.0  ;;  %v874_v53 = vmul.f32 127.5, %v810_v4  ;;  %v462_v15 = vadd.f32 %v2326_v8, %v2241_v19  ;;  %v573_v58 = vpop.f32.mrf.mxu0 }
  0xf6   :  { %1373 = vst [vmem:[%s2591_s4 + $0x40] sm:$0xff] %v1343_v57  ;;  %v1353_v31 = vpack.c.b16 %v1852_v10, %v1849_v32  ;;  %v1354_v7 = vpack.c.b16 %v1858_v11, %v1855_v0  ;;  %v876_v36 = vmul.f32 127.5, %v812_v14  ;;  %v515_v3 = vadd.f32 %v2328_v13, %v2243_v20  ;;  %v626_v37 = vpop.f32.mrf.mxu1 }
  0xf7   :  { %v1723_v9 = vcvt.f32.s32 %v1587_v16  ;;  %v1585_v43 = vclamp-gez-f32 %v874_v53, 255.0  ;;  %1954 = vtanh.f32 %v462_v15  ;;  %v464_v40 = vadd.f32 %v2330_v30, %v2245_v21  ;;  %v575_v47 = vpop.f32.mrf.mxu0 }
  0xf8   :  { %v1355_v8 = vpack.c.b8 %v1354_v7, %v1353_v31  ;;  %v1589_v52 = vclamp-gez-f32 %v876_v36, 255.0  ;;  %1956 = vtanh.f32 %v515_v3  ;;  %v517_v57 = vadd.f32 %v2332_v38, %v2247_v22  ;;  %v628_v32 = vpop.f32.mrf.mxu1 }
  0xf9   :  { %v1720_v55 = vcvt.f32.s32 %v1585_v43  ;;  %1958 = vtanh.f32 %v464_v40  ;;  %v468_v13 = vadd.f32 %v2334_v48, %v2241_v19  ;;  %v521_v53 = vadd.f32 %v2336_v56, %v2243_v20  ;;  %v577_v16 = vpop.f32.mrf.mxu0 }
  0xfa   :  { %1377 = vst [vmem:[%s2591_s4 + $0x60] sm:$0xff] %v1355_v8  ;;  %v1726_v30 = vcvt.f32.s32 %v1589_v52  ;;  %1960 = vtanh.f32 %v517_v57  ;;  %v470_v17 = vadd.f32 %v2338_v62, %v2245_v21  ;;  %v523_v38 = vadd.f32 %v2340_v5, %v2247_v22  ;;  %v630_v59 = vpop.f32.mrf.mxu1 }
  0xfb   :  { %v1320_v0 = vpack.c.b16 %v1720_v55, %v1717_v63  ;;  %1962 = vtanh.f32 %v468_v13  ;;  %v472_v48 = vadd.f32 %v2342_v12, %v2241_v19  ;;  %v579_v56 = vpop.f32.mrf.mxu0  ;;  %v1897_v2 = vtrunc.f32 %v2305_v45 }
  0xfc   :  { %v1321_v1 = vpack.c.b16 %v1726_v30, %v1723_v9  ;;  %1964 = vtanh.f32 %v521_v53  ;;  %v525_v4 = vadd.f32 %v2344_v33, %v2243_v20  ;;  %v632_v10 = vpop.f32.mrf.mxu1  ;;  %v1899_v62 = vtrunc.f32 %v2307_v46 }
  0xfd   :  { %1966 = vtanh.f32 %v470_v17  ;;  %v474_v5 = vadd.f32 %v2346_v44, %v2245_v21  ;;  %v527_v11 = vadd.f32 %v2348_v54, %v2247_v22  ;;  %v669_v14 = vpop.f32.mrf.mxu0  ;;  %v2596_v19 = vtrunc.f32 %v2302_v41 }
  0xfe   :  { %v1322_v45 = vpack.c.b8 %v1321_v1, %v1320_v0  ;;  %1968 = vtanh.f32 %v523_v38  ;;  %v564_v20 = vadd.f32 %v2353_v61, %v2249_v23  ;;  %v617_v33 = vadd.f32 %v2355_v6, %v2251_v25  ;;  %v722_v63 = vpop.f32.mrf.mxu1 }
  0xff   :  { %v2404_v12 = vcvt.f32.s32 %v2596_v19  ;;  %1970 = vtanh.f32 %v472_v48  ;;  %v566_v21 = vadd.f32 %v2357_v29, %v2253_v26  ;;  %v619_v22 = vadd.f32 %v2359_v39, %v2255_v27  ;;  %v671_v44 = vpop.f32.mrf.mxu0 }
 0x100   :  { %v568_v41 = vadd.f32 %v2364_v51, %v2249_v23  ;;  %1366 = vst [vmem:[%s2591_s4 + $0x8] sm:$0xff] %v1322_v45  ;;  %1972 = vtanh.f32 %v525_v4  ;;  %v621_v54 = vadd.f32 %v2366_v60, %v2251_v25  ;;  %v570_v61 = vadd.f32 %v2368_v18, %v2253_v26  ;;  %v724_v29 = vpop.f32.mrf.mxu1 }
 0x101   :  { %v623_v6 = vadd.f32 %v622_v24, %v2255_v27  ;;  %1974 = vtanh.f32 %v474_v5  ;;  %v2425_v39 = vadd.f32 %v573_v58, %v2249_v23  ;;  %v2428_v51 = vadd.f32 %v626_v37, %v2251_v25  ;;  %v673_v31 = vpop.f32.mrf.mxu0 }
 0x102   :  { %v2431_v15 = vadd.f32 %v575_v47, %v2253_v26  ;;  %1976 = vtanh.f32 %v527_v11  ;;  %v2434_v60 = vadd.f32 %v628_v32, %v2255_v27  ;;  %v2437_v18 = vadd.f32 %v577_v16, %v2249_v23  ;;  %v726_v7 = vpop.f32.mrf.mxu1 }
 0x103   :  { %v2440_v24 = vadd.f32 %v630_v59, %v2251_v25  ;;  %1978 = vtanh.f32 %v564_v20  ;;  %v2443_v58 = vadd.f32 %v579_v56, %v2253_v26  ;;  %v2446_v36 = vadd.f32 %v632_v10, %v2255_v27  ;;  %v675_v37 = vpop.f32.mrf.mxu0 }
 0x104   :  { %v2449_v3 = vadd.f32 %v669_v14, %v2257_v28  ;;  %v1955_v9 = vpop.eup %1954  ;;  %1980 = vtanh.f32 %v617_v33  ;;  %v2452_v23 = vadd.f32 %v722_v63, %v2269_v34  ;;  %v2455_v25 = vadd.f32 %v671_v44, %v2271_v35  ;;  %v728_v26 = vpop.f32.mrf.mxu1 }
 0x105   :  { %v2458_v43 = vadd.f32 %v724_v29, %v2283_v42  ;;  %v1957_v40 = vpop.eup %1956  ;;  %v825_v47 = vadd.f32 1.0, %v1955_v9  ;;  %1982 = vtanh.f32 %v566_v21  ;;  %v2461_v27 = vadd.f32 %v673_v31, %v2257_v28  ;;  %v679_v52 = vpop.f32.mrf.mxu0 }
 0x106   :  { %v2464_v8 = vadd.f32 %v726_v7, %v2269_v34  ;;  %v1959_v57 = vpop.eup %1958  ;;  %v827_v32 = vadd.f32 1.0, %v1957_v40  ;;  %1984 = vtanh.f32 %v619_v22  ;;  %v2467_v55 = vadd.f32 %v675_v37, %v2271_v35 }
 0x107   :  { %v2470_v13 = vadd.f32 %v728_v26, %v2283_v42  ;;  %v1961_v53 = vpop.eup %1960  ;;  %v889_v16 = vmul.f32 127.5, %v825_v47  ;;  %v826_v30 = vadd.f32 1.0, %v1959_v57  ;;  %1986 = vtanh.f32 %v568_v41 }
 0x108   :  { %v2472_v17 = vcvt.f32.s32 %v1897_v2  ;;  %v1963_v38 = vpop.eup %1962  ;;  %v891_v59 = vmul.f32 127.5, %v827_v32  ;;  %v828_v0 = vadd.f32 1.0, %v1961_v53  ;;  %1988 = vtanh.f32 %v621_v54 }
 0x109   :  { %v2475_v48 = vadd.f32 %v679_v52, %v2257_v28  ;;  %v1965_v56 = vpop.eup %1964  ;;  %v1615_v1 = vclamp-gez-f32 %v889_v16, 255.0  ;;  %v890_v4 = vmul.f32 127.5, %v826_v30  ;;  %v841_v10 = vadd.f32 1.0, %v1963_v38 }
 0x10a   :  { %1990 = vtanh.f32 %v570_v61  ;;  %v1967_v5 = vpop.eup %1966  ;;  %v1619_v11 = vclamp-gez-f32 %v891_v59, 255.0  ;;  %v892_v14 = vmul.f32 127.5, %v828_v0  ;;  %v843_v19 = vadd.f32 1.0, %v1965_v56 }
 0x10b   :  { %1992 = vtanh.f32 %v623_v6  ;;  %v1969_v45 = vpop.eup %1968  ;;  %v1765_v2 = vcvt.f32.s32 %v1615_v1  ;;  %v1617_v20 = vclamp-gez-f32 %v890_v4, 255.0  ;;  %v905_v33 = vmul.f32 127.5, %v841_v10 }
 0x10c   :  { %v842_v63 = vadd.f32 1.0, %v1967_v5  ;;  %v1971_v21 = vpop.eup %1970  ;;  %v1771_v22 = vcvt.f32.s32 %v1619_v11  ;;  %v1621_v41 = vclamp-gez-f32 %v892_v14, 255.0  ;;  %v907_v44 = vmul.f32 127.5, %v843_v19 }
 0x10d   :  { %v844_v54 = vadd.f32 1.0, %v1969_v45  ;;  %v1973_v29 = vpop.eup %1972  ;;  %v1768_v31 = vcvt.f32.s32 %v1617_v20  ;;  %v1647_v7 = vclamp-gez-f32 %v905_v33, 255.0  ;;  %v857_v61 = vadd.f32 1.0, %v1971_v21 }
 0x10e   :  { %v906_v37 = vmul.f32 127.5, %v842_v63  ;;  %v1975_v9 = vpop.eup %1974  ;;  %v1774_v26 = vcvt.f32.s32 %v1621_v41  ;;  %v1651_v40 = vclamp-gez-f32 %v907_v44, 255.0  ;;  %v859_v6 = vadd.f32 1.0, %v1973_v29 }
 0x10f   :  { %v908_v47 = vmul.f32 127.5, %v844_v54  ;;  %v1977_v52 = vpop.eup %1976  ;;  %v1332_v57 = vpack.c.b16 %v1768_v31, %v1765_v2  ;;  %v1813_v32 = vcvt.f32.s32 %v1647_v7  ;;  %v921_v16 = vmul.f32 127.5, %v857_v61 }
 0x110   :  { %v1649_v53 = vclamp-gez-f32 %v906_v37, 255.0  ;;  %v1979_v30 = vpop.eup %1978  ;;  %v1333_v38 = vpack.c.b16 %v1774_v26, %v1771_v22  ;;  %v1819_v59 = vcvt.f32.s32 %v1651_v40  ;;  %v923_v56 = vmul.f32 127.5, %v859_v6 }
 0x111   :  { %v1653_v0 = vclamp-gez-f32 %v908_v47, 255.0  ;;  %v1981_v1 = vpop.eup %1980  ;;  %v1679_v10 = vclamp-gez-f32 %v921_v16, 255.0  ;;  %v858_v5 = vadd.f32 1.0, %v1975_v9  ;;  %v860_v11 = vadd.f32 1.0, %v1977_v52 }
 0x112   :  { %v1816_v4 = vcvt.f32.s32 %v1649_v53  ;;  %v1983_v14 = vpop.eup %1982  ;;  %v1334_v19 = vpack.c.b8 %v1333_v38, %v1332_v57  ;;  %v1683_v20 = vclamp-gez-f32 %v923_v56, 255.0  ;;  %v813_v33 = vadd.f32 1.0, %v1979_v30 }
 0x113   :  { %v1822_v45 = vcvt.f32.s32 %v1653_v0  ;;  %v1985_v63 = vpop.eup %1984  ;;  %v1861_v21 = vcvt.f32.s32 %v1679_v10  ;;  %v922_v41 = vmul.f32 127.5, %v858_v5  ;;  %v924_v44 = vmul.f32 127.5, %v860_v11 }
 0x114   :  { %v1344_v2 = vpack.c.b16 %v1816_v4, %v1813_v32  ;;  %v1987_v54 = vpop.eup %1986  ;;  %1370 = vst [vmem:[%s2591_s4 + $0x28] sm:$0xff] %v1334_v19  ;;  %v1867_v29 = vcvt.f32.s32 %v1683_v20  ;;  %v877_v31 = vmul.f32 127.5, %v813_v33  ;;  %v815_v7 = vadd.f32 1.0, %v1981_v1  ;;  %v732_v19 = vpop.f32.mrf.mxu1 }
 0x115   :  { %v1345_v22 = vpack.c.b16 %v1822_v45, %v1819_v59  ;;  %v1989_v37 = vpop.eup %1988  ;;  %v1681_v61 = vclamp-gez-f32 %v922_v41, 255.0  ;;  %v1685_v9 = vclamp-gez-f32 %v924_v44, 255.0  ;;  %v814_v26 = vadd.f32 1.0, %v1983_v14 }
 0x116   :  { %v816_v40 = vadd.f32 1.0, %v1985_v63  ;;  %v1591_v52 = vclamp-gez-f32 %v877_v31, 255.0  ;;  %v879_v57 = vmul.f32 127.5, %v815_v7  ;;  %v829_v32 = vadd.f32 1.0, %v1987_v54 }
 0x117   :  { %v1991_v47 = vpop.eup %1990  ;;  %v1346_v6 = vpack.c.b8 %v1345_v22, %v1344_v2  ;;  %v1864_v16 = vcvt.f32.s32 %v1681_v61  ;;  %v1870_v30 = vcvt.f32.s32 %v1685_v9  ;;  %v878_v38 = vmul.f32 127.5, %v814_v26  ;;  %v681_v2 = vpop.f32.mrf.mxu0 }
 0x118   :  { %v1993_v53 = vpop.eup %1992  ;;  %v880_v0 = vmul.f32 127.5, %v816_v40  ;;  %v1729_v59 = vcvt.f32.s32 %v1591_v52  ;;  %v1595_v56 = vclamp-gez-f32 %v879_v57, 255.0  ;;  %v893_v1 = vmul.f32 127.5, %v829_v32  ;;  %v734_v9 = vpop.f32.mrf.mxu1 }
 0x119   :  { %1374 = vst [vmem:[%s2591_s4 + $0x48] sm:$0xff] %v1346_v6  ;;  %v831_v4 = vadd.f32 1.0, %v1989_v37  ;;  %v1356_v10 = vpack.c.b16 %v1864_v16, %v1861_v21  ;;  %v1357_v5 = vpack.c.b16 %v1870_v30, %v1867_v29  ;;  %v1593_v11 = vclamp-gez-f32 %v878_v38, 255.0  ;;  %v683_v46 = vpop.f32.mrf.mxu0  ;;  %v2597_v16 = vld [vmem:[#allocation2_spill] sm:$0xff] }
 0x11a   :  { %v1597_v14 = vclamp-gez-f32 %v880_v0, 255.0  ;;  %v1735_v45 = vcvt.f32.s32 %v1595_v56  ;;  %v1623_v20 = vclamp-gez-f32 %v893_v1, 255.0  ;;  %v830_v63 = vadd.f32 1.0, %v1991_v47  ;;  %v2599_v1 = vld [vmem:[#allocation4_spill] sm:$0xff] }
 0x11b   :  { %v895_v33 = vmul.f32 127.5, %v831_v4  ;;  %v1358_v41 = vpack.c.b8 %v1357_v5, %v1356_v10  ;;  %v1732_v44 = vcvt.f32.s32 %v1593_v11  ;;  %v832_v22 = vadd.f32 1.0, %v1993_v53 }
 0x11c   :  { %v1738_v54 = vcvt.f32.s32 %v1597_v14  ;;  %v894_v7 = vmul.f32 127.5, %v830_v63  ;;  %1994 = vtanh.f32 %v2425_v39  ;;  %v1900_v21 = vcvt.f32.s32 %v1899_v62  ;;  %v736_v14 = vpop.f32.mrf.mxu1 }
 0x11d   :  { %v1627_v31 = vclamp-gez-f32 %v895_v33, 255.0  ;;  %1378 = vst [vmem:[%s2591_s4 + $0x68] sm:$0xff] %v1358_v41  ;;  %v1323_v29 = vpack.c.b16 %v1732_v44, %v1729_v59  ;;  %v896_v61 = vmul.f32 127.5, %v832_v22  ;;  %1996 = vtanh.f32 %v2428_v51  ;;  %v2598_v59 = vld [vmem:[#allocation3_spill] sm:$0xff] }
 0x11e   :  { %v1324_v37 = vpack.c.b16 %v1738_v54, %v1735_v45  ;;  %v1625_v26 = vclamp-gez-f32 %v894_v7, 255.0  ;;  %1998 = vtanh.f32 %v2431_v15  ;;  %v2492_v40 = vadd.f32 %v732_v19, %v2269_v34 }
 0x11f   :  { %v2495_v39 = vadd.f32 %v681_v2, %v2271_v35  ;;  %v1777_v47 = vcvt.f32.s32 %v1623_v20  ;;  %v1629_v6 = vclamp-gez-f32 %v896_v61, 255.0  ;;  %2000 = vtanh.f32 %v2434_v60  ;;  %v685_v2 = vpop.f32.mrf.mxu0 }
 0x120   :  { %v1325_v62 = vpack.c.b8 %v1324_v37, %v1323_v29  ;;  %v1783_v52 = vcvt.f32.s32 %v1627_v31  ;;  %v1780_v57 = vcvt.f32.s32 %v1625_v26  ;;  %2002 = vtanh.f32 %v2437_v18 }
 0x121   :  { %v2500_v51 = vadd.f32 %v734_v9, %v2283_v42  ;;  %v1786_v15 = vcvt.f32.s32 %v1629_v6  ;;  %2004 = vtanh.f32 %v2440_v24  ;;  %v2507_v32 = vadd.f32 %v683_v46, %v2257_v28 }
 0x122   :  { %1367 = vst [vmem:[%s2591_s4 + $0x10] sm:$0xff] %v1325_v62  ;;  %v1901_v53 = vtrunc.f32 %v2310_v49  ;;  %v1335_v60 = vpack.c.b16 %v1780_v57, %v1777_v47  ;;  %2006 = vtanh.f32 %v2443_v58  ;;  %v1903_v18 = vtrunc.f32 %v2312_v50 }
 0x123   :  { %v1905_v30 = vtrunc.f32 %v2597_v16  ;;  %v1336_v38 = vpack.c.b16 %v1786_v15, %v1783_v52  ;;  %2008 = vtanh.f32 %v2446_v36  ;;  %v1907_v56 = vtrunc.f32 %v2598_v59 }
 0x124   :  { %v1902_v0 = vcvt.f32.s32 %v1901_v53  ;;  %2010 = vtanh.f32 %v2449_v3  ;;  %v1904_v24 = vcvt.f32.s32 %v1903_v18  ;;  %v1909_v4 = vtrunc.f32 %v2599_v1 }
 0x125   :  { %v1906_v28 = vcvt.f32.s32 %v1905_v30  ;;  %v1337_v49 = vpack.c.b8 %v1336_v38, %v1335_v60  ;;  %2012 = vtanh.f32 %v2452_v23  ;;  %v1908_v58 = vcvt.f32.s32 %v1907_v56 }
 0x126   :  { %v1429_v50 = vpack.c.b16 %v2404_v12, %v2404_v12  ;;  %2014 = vtanh.f32 %v2455_v25  ;;  %v1910_v10 = vcvt.f32.s32 %v1909_v4  ;;  %v1431_v36 = vpack.c.b16 %v2472_v17, %v2472_v17 }
 0x127   :  { %v1433_v5 = vpack.c.b16 %v1900_v21, %v1900_v21  ;;  %1371 = vst [vmem:[%s2591_s4 + $0x30] sm:$0xff] %v1337_v49  ;;  %2016 = vtanh.f32 %v2458_v43  ;;  %v1435_v11 = vpack.c.b16 %v1902_v0, %v1902_v0  ;;  %v1437_v23 = vpack.c.b16 %v1904_v24, %v1904_v24 }
 0x128   :  { %v1430_v3 = vpack.c.b8 %v1429_v50, %v1429_v50  ;;  %2018 = vtanh.f32 %v2461_v27  ;;  %v1432_v12 = vpack.c.b8 %v1431_v36, %v1431_v36  ;;  %v1439_v25 = vpack.c.b16 %v1906_v28, %v1906_v28 }
 0x129   :  { %v1434_v19 = vpack.c.b8 %v1433_v5, %v1433_v5  ;;  %v1995_v45 = vpop.eup %1994  ;;  %2020 = vtanh.f32 %v2464_v8  ;;  %v1436_v17 = vpack.c.b8 %v1435_v11, %v1435_v11  ;;  %v1438_v20 = vpack.c.b8 %v1437_v23, %v1437_v23 }
 0x12a   :  { %v1441_v33 = vpack.c.b16 %v1908_v58, %v1908_v58  ;;  %1445 = vst [vmem:[%s2592_s5] sm:$0x3] %v1430_v3  ;;  %v1997_v43 = vpop.eup %1996  ;;  %v845_v63 = vadd.f32 1.0, %v1995_v45  ;;  %2022 = vtanh.f32 %v2467_v55  ;;  %v1440_v27 = vpack.c.b8 %v1439_v25, %v1439_v25  ;;  %1446 = vst [vmem:[%s2592_s5 + $0x2] sm:$0x3] %v1432_v12 }
 0x12b   :  { %v1443_v41 = vpack.c.b16 %v1910_v10, %v1910_v10  ;;  %1447 = vst [vmem:[%s2592_s5 + $0x4] sm:$0x3] %v1434_v19  ;;  %v1999_v8 = vpop.eup %1998  ;;  %v847_v44 = vadd.f32 1.0, %v1997_v43  ;;  %2024 = vtanh.f32 %v2470_v13  ;;  %v2541_v54 = vadd.f32 %v736_v14, %v2269_v34  ;;  %1448 = vst [vmem:[%s2592_s5 + $0x6] sm:$0x3] %v1436_v17 }
 0x12c   :  { %v1442_v22 = vpack.c.b8 %v1441_v33, %v1441_v33  ;;  %1449 = vst [vmem:[%s2592_s5 + $0x8] sm:$0x3] %v1438_v20  ;;  %v2001_v55 = vpop.eup %2000  ;;  %v909_v31 = vmul.f32 127.5, %v845_v63  ;;  %v846_v7 = vadd.f32 1.0, %v1999_v8  ;;  %2026 = vtanh.f32 %v2475_v48  ;;  %1450 = vst [vmem:[%s2592_s5 + $0xa] sm:$0x3] %v1440_v27 }
 0x12d   :  { %v1444_v21 = vpack.c.b8 %v1443_v41, %v1443_v41  ;;  %v2003_v34 = vpop.eup %2002  ;;  %v911_v13 = vmul.f32 127.5, %v847_v44  ;;  %v848_v29 = vadd.f32 1.0, %v2001_v55  ;;  %2028 = vtanh.f32 %v2492_v40 }
 0x12e   :  { %v2555_v37 = vadd.f32 %v685_v2, %v2271_v35  ;;  %1451 = vst [vmem:[%s2592_s5 + $0xc] sm:$0x3] %v1442_v22  ;;  %v2005_v61 = vpop.eup %2004  ;;  %v1655_v9 = vclamp-gez-f32 %v909_v31, 255.0  ;;  %v910_v48 = vmul.f32 127.5, %v846_v7  ;;  %v861_v26 = vadd.f32 1.0, %v2003_v34 }
 0x12f   :  { %2030 = vtanh.f32 %v2495_v39  ;;  %1452 = vst [vmem:[%s2592_s5 + $0xe] sm:$0x3] %v1444_v21  ;;  %v2007_v46 = vpop.eup %2006  ;;  %v1659_v62 = vclamp-gez-f32 %v911_v13, 255.0  ;;  %v912_v40 = vmul.f32 127.5, %v848_v29  ;;  %v863_v47 = vadd.f32 1.0, %v2005_v61 }
 0x130   :  { %2032 = vtanh.f32 %v2500_v51  ;;  %v2009_v35 = vpop.eup %2008  ;;  %v1825_v6 = vcvt.f32.s32 %v1655_v9  ;;  %v1657_v52 = vclamp-gez-f32 %v910_v48, 255.0  ;;  %v925_v57 = vmul.f32 127.5, %v861_v26  ;;  %v738_v26 = vpop.f32.mrf.mxu1 }
 0x131   :  { %v862_v15 = vadd.f32 1.0, %v2007_v46  ;;  %v2011_v53 = vpop.eup %2010  ;;  %v1831_v60 = vcvt.f32.s32 %v1659_v62  ;;  %v1661_v18 = vclamp-gez-f32 %v912_v40, 255.0  ;;  %v927_v16 = vmul.f32 127.5, %v863_v47 }
 0x132   :  { %v864_v39 = vadd.f32 1.0, %v2009_v35  ;;  %v2013_v30 = vpop.eup %2012  ;;  %v1828_v38 = vcvt.f32.s32 %v1657_v52  ;;  %v1687_v0 = vclamp-gez-f32 %v925_v57, 255.0  ;;  %v817_v56 = vadd.f32 1.0, %v2011_v53 }
 0x133   :  { %v926_v59 = vmul.f32 127.5, %v862_v15  ;;  %v2015_v24 = vpop.eup %2014  ;;  %v1834_v28 = vcvt.f32.s32 %v1661_v18  ;;  %v1691_v1 = vclamp-gez-f32 %v927_v16, 255.0  ;;  %v819_v51 = vadd.f32 1.0, %v2013_v30 }
 0x134   :  { %v928_v4 = vmul.f32 127.5, %v864_v39  ;;  %v2017_v49 = vpop.eup %2016  ;;  %v1347_v58 = vpack.c.b16 %v1828_v38, %v1825_v6  ;;  %v1873_v50 = vcvt.f32.s32 %v1687_v0  ;;  %v881_v36 = vmul.f32 127.5, %v817_v56 }
 0x135   :  { %v1689_v10 = vclamp-gez-f32 %v926_v59, 255.0  ;;  %v2019_v5 = vpop.eup %2018  ;;  %v1348_v3 = vpack.c.b16 %v1834_v28, %v1831_v60  ;;  %v1879_v11 = vcvt.f32.s32 %v1691_v1  ;;  %v883_v14 = vmul.f32 127.5, %v819_v51 }
 0x136   :  { %v1693_v23 = vclamp-gez-f32 %v928_v4, 255.0  ;;  %v2021_v12 = vpop.eup %2020  ;;  %v1599_v25 = vclamp-gez-f32 %v881_v36, 255.0  ;;  %v818_v45 = vadd.f32 1.0, %v2015_v24  ;;  %v820_v17 = vadd.f32 1.0, %v2017_v49 }
 0x137   :  { %v1876_v19 = vcvt.f32.s32 %v1689_v10  ;;  %v2023_v20 = vpop.eup %2022  ;;  %v1349_v33 = vpack.c.b8 %v1348_v3, %v1347_v58  ;;  %v1603_v63 = vclamp-gez-f32 %v883_v14, 255.0  ;;  %v833_v2 = vadd.f32 1.0, %v2019_v5 }
 0x138   :  { %v1882_v43 = vcvt.f32.s32 %v1693_v23  ;;  %v2025_v27 = vpop.eup %2024  ;;  %v1741_v8 = vcvt.f32.s32 %v1599_v25  ;;  %v882_v44 = vmul.f32 127.5, %v818_v45  ;;  %v884_v22 = vmul.f32 127.5, %v820_v17 }
 0x139   :  { %v1359_v41 = vpack.c.b16 %v1876_v19, %v1873_v50  ;;  %v2027_v55 = vpop.eup %2026  ;;  %1375 = vst [vmem:[%s2591_s4 + $0x50] sm:$0xff] %v1349_v33  ;;  %v1747_v7 = vcvt.f32.s32 %v1603_v63  ;;  %v897_v21 = vmul.f32 127.5, %v833_v2  ;;  %v835_v34 = vadd.f32 1.0, %v2021_v12 }
 0x13a   :  { %v1360_v31 = vpack.c.b16 %v1882_v43, %v1879_v11  ;;  %v2029_v13 = vpop.eup %2028  ;;  %v1601_v29 = vclamp-gez-f32 %v882_v44, 255.0  ;;  %v1605_v61 = vclamp-gez-f32 %v884_v22, 255.0  ;;  %v834_v9 = vadd.f32 1.0, %v2023_v20 }
 0x13b   :  { %v836_v48 = vadd.f32 1.0, %v2025_v27  ;;  %v1631_v40 = vclamp-gez-f32 %v897_v21, 255.0  ;;  %v899_v47 = vmul.f32 127.5, %v835_v34  ;;  %v849_v35 = vadd.f32 1.0, %v2027_v55 }
 0x13c   :  { %v2031_v46 = vpop.eup %2030  ;;  %v1361_v62 = vpack.c.b8 %v1360_v31, %v1359_v41  ;;  %v1744_v52 = vcvt.f32.s32 %v1601_v29  ;;  %v1750_v57 = vcvt.f32.s32 %v1605_v61  ;;  %v898_v15 = vmul.f32 127.5, %v834_v9 }
 0x13d   :  { %v2033_v6 = vpop.eup %2032  ;;  %v900_v53 = vmul.f32 127.5, %v836_v48  ;;  %v1635_v60 = vclamp-gez-f32 %v899_v47, 255.0  ;;  %v913_v18 = vmul.f32 127.5, %v849_v35  ;;  %v851_v16 = vadd.f32 1.0, %v2029_v13 }
 0x13e   :  { %1379 = vst [vmem:[%s2591_s4 + $0x70] sm:$0xff] %v1361_v62  ;;  %v739_v39 = vadd.f32 %v738_v26, %v2283_v42  ;;  %v1326_v30 = vpack.c.b16 %v1744_v52, %v1741_v8  ;;  %v1327_v38 = vpack.c.b16 %v1750_v57, %v1747_v7  ;;  %v1633_v0 = vclamp-gez-f32 %v898_v15, 255.0 }
 0x13f   :  { %v1637_v59 = vclamp-gez-f32 %v900_v53, 255.0  ;;  %v1789_v56 = vcvt.f32.s32 %v1631_v40  ;;  %v1795_v24 = vcvt.f32.s32 %v1635_v60  ;;  %v915_v28 = vmul.f32 127.5, %v851_v16 }
 0x140   :  { %v850_v1 = vadd.f32 1.0, %v2031_v46  ;;  %v1328_v4 = vpack.c.b8 %v1327_v38, %v1326_v30  ;;  %v1792_v51 = vcvt.f32.s32 %v1633_v0  ;;  %v852_v58 = vadd.f32 1.0, %v2033_v6 }
 0x141   :  { %v1798_v49 = vcvt.f32.s32 %v1637_v59  ;;  %v1663_v50 = vclamp-gez-f32 %v913_v18, 255.0  ;;  %v1667_v10 = vclamp-gez-f32 %v915_v28, 255.0  ;;  %2034 = vtanh.f32 %v2507_v32 }
 0x142   :  { %v914_v36 = vmul.f32 127.5, %v850_v1  ;;  %1368 = vst [vmem:[%s2591_s4 + $0x18] sm:$0xff] %v1328_v4  ;;  %v1338_v42 = vpack.c.b16 %v1792_v51, %v1789_v56  ;;  %v916_v3 = vmul.f32 127.5, %v852_v58  ;;  %2036 = vtanh.f32 %v2541_v54 }
 0x143   :  { %v1339_v5 = vpack.c.b16 %v1798_v49, %v1795_v24  ;;  %2038 = vtanh.f32 %v2555_v37  ;;  %v1837_v12 = vcvt.f32.s32 %v1663_v50  ;;  %v1843_v32 = vcvt.f32.s32 %v1667_v10 }
 0x144   :  { %v1665_v11 = vclamp-gez-f32 %v914_v36, 255.0  ;;  %v1669_v14 = vclamp-gez-f32 %v916_v3, 255.0  ;;  %2040 = vtanh.f32 %v739_v39 }
 0x145   :  { %v1340_v23 = vpack.c.b8 %v1339_v5, %v1338_v42 }
 0x146   :  { %v1840_v19 = vcvt.f32.s32 %v1665_v11  ;;  %v1846_v25 = vcvt.f32.s32 %v1669_v14 }
 0x147   :  { %1372 = vst [vmem:[%s2591_s4 + $0x38] sm:$0xff] %v1340_v23 }
 0x148   :  { %v1350_v45 = vpack.c.b16 %v1840_v19, %v1837_v12  ;;  %v1351_v17 = vpack.c.b16 %v1846_v25, %v1843_v32 }
 0x14a   :  { %v1352_v20 = vpack.c.b8 %v1351_v17, %v1350_v45 }
 0x14c   :  { %1376 = vst [vmem:[%s2591_s4 + $0x58] sm:$0xff] %v1352_v20 }
 0x14e   :  { %v2035_v54 = vpop.eup %2034 }
 0x14f   :  { %v2037_v37 = vpop.eup %2036  ;;  %v865_v33 = vadd.f32 1.0, %v2035_v54 }
 0x150   :  { %v2039_v43 = vpop.eup %2038  ;;  %v867_v63 = vadd.f32 1.0, %v2037_v37 }
 0x151   :  { %v2041_v2 = vpop.eup %2040  ;;  %v929_v27 = vmul.f32 127.5, %v865_v33  ;;  %v866_v41 = vadd.f32 1.0, %v2039_v43 }
 0x152   :  { %v931_v8 = vmul.f32 127.5, %v867_v63  ;;  %v868_v44 = vadd.f32 1.0, %v2041_v2 }
 0x153   :  { %v1695_v22 = vclamp-gez-f32 %v929_v27, 255.0  ;;  %v930_v55 = vmul.f32 127.5, %v866_v41 }
 0x154   :  { %v1699_v31 = vclamp-gez-f32 %v931_v8, 255.0  ;;  %v932_v7 = vmul.f32 127.5, %v868_v44 }
 0x155   :  { %v1697_v21 = vclamp-gez-f32 %v930_v55, 255.0  ;;  %v1885_v13 = vcvt.f32.s32 %v1695_v22 }
 0x156   :  { %v1701_v34 = vclamp-gez-f32 %v932_v7, 255.0  ;;  %v1891_v61 = vcvt.f32.s32 %v1699_v31 }
 0x157   :  { %v1888_v29 = vcvt.f32.s32 %v1697_v21 }
 0x158   :  { %v1894_v9 = vcvt.f32.s32 %v1701_v34 }
 0x159   :  { %v1362_v48 = vpack.c.b16 %v1888_v29, %v1885_v13 }
 0x15a   :  { %v1363_v26 = vpack.c.b16 %v1894_v9, %v1891_v61 }
 0x15c   :  { %v1364_v46 = vpack.c.b8 %v1363_v26, %v1362_v48 }
 0x15e   :  { %1380 = vst [vmem:[%s2591_s4 + $0x78] sm:$0xff] %v1364_v46 }

</bundles_post_ra>
